<compile_context>
chip_gen: v5e
topology: v5e:2x2
jax: 0.10.0
libtpu: 0.0.40
codegen_flags: <defaults>
</compile_context>

<pallas_src>
import math

import jax
import jax.numpy as jnp
from jax.experimental import pallas as pl
from jax.experimental.pallas import tpu as pltpu

HIDDEN = 64     # logical hidden width of fc1/fc2
LANE = 128      # hidden width is padded to exactly one lane tile


def _round_up(n, m):
    return ((n + m - 1) // m) * m


def _critic_kernel(x_ref, w1_ref, b1_ref, w2_ref, b2_ref, w3_ref, b3_ref, o_ref):
    # f32 x streamed from HBM; cast to bf16 here (rides on idle VPU slots)
    # instead of a separate wrapper-side XLA pass.
    x = x_ref[...].astype(jnp.bfloat16)
    # fc1: bf16 x bf16 -> f32 accumulation; bias + ReLU in f32.
    h = jnp.dot(x, w1_ref[...], preferred_element_type=jnp.float32)
    h = jnp.maximum(h + b1_ref[...], 0.0)
    # fc2
    h = jnp.dot(h.astype(jnp.bfloat16), w2_ref[...],
                preferred_element_type=jnp.float32)
    h = jnp.maximum(h + b2_ref[...], 0.0)
    # fc3 (no activation). Output block is only out_dim (=40) lanes wide, so
    # the HBM writeback carries no padding bytes.
    out = jnp.dot(h.astype(jnp.bfloat16), w3_ref[...],
                  preferred_element_type=jnp.float32)
    o_ref[...] = (out + b3_ref[...]).astype(o_ref.dtype)


def critic_forward(x, params, num_actions, num_quant, *, block_b=1024):
    """Fused fc1->ReLU->fc2->ReLU->fc3.

    Batch streamed in large double-buffered tiles; the tiny (~30 KB) weights
    use constant index maps so they stay VMEM-resident with no re-DMA.
    """
    w1, b1, w2, b2, w3, b3 = params
    B, in_dim = x.shape
    out_dim = num_actions * num_quant
    assert w3.shape[1] == out_dim and b3.shape[1] == out_dim

    # Batch tile: large (amortizes ~0.35 us/step grid overhead), multiple of
    # 16 (bf16 sublane packing), capped at block_b.
    tb = min(block_b, _round_up(B, 16))
    # Prefer >= 2 grid steps for reasonably large batches so the "parallel"
    # batch axis can shard across both TensorCores on v7x.
    if B >= 256 and _round_up(B, tb) // tb < 2:
        tb = _round_up((B + 1) // 2, 16)
    b_pad = _round_up(B, tb)
    if b_pad != B:
        x = jnp.pad(x, ((0, b_pad - B), (0, 0)))   # f32; bf16 cast is in-kernel
    num_tiles = b_pad // tb

    flops = 2 * b_pad * (in_dim * w1.shape[1]
                         + w2.shape[0] * w2.shape[1]
                         + w3.shape[0] * w3.shape[1])
    weight_bytes = sum(int(p.size) * p.dtype.itemsize for p in params)
    bytes_accessed = b_pad * in_dim * 4 + b_pad * out_dim * 4 + weight_bytes

    # Explicit scoped-VMEM budget with headroom: double-buffered x/out tiles +
    # resident weights + a few (tb, 128) f32 intermediates. Matters on v5e
    # (16 MiB default scoped limit) if block_b is pushed to multi-thousand rows.
    x_tile_bytes = tb * in_dim * 4
    out_tile_bytes = tb * out_dim * 4
    interm_bytes = 4 * tb * LANE * 4
    vmem_need = 2 * (x_tile_bytes + out_tile_bytes) + weight_bytes + interm_bytes
    vmem_limit = int(min(max(2 * vmem_need, 32 << 20), 64 << 20))

    const = lambda i: (0, 0)
    out = pl.pallas_call(
        _critic_kernel,
        out_shape=jax.ShapeDtypeStruct((b_pad, out_dim), jnp.float32),
        grid=(num_tiles,),
        in_specs=[
            pl.BlockSpec((tb, in_dim), lambda i: (i, 0)),   # x streams per tile
            pl.BlockSpec(w1.shape, const),                  # weights resident
            pl.BlockSpec(b1.shape, const),
            pl.BlockSpec(w2.shape, const),
            pl.BlockSpec(b2.shape, const),
            pl.BlockSpec(w3.shape, const),
            pl.BlockSpec(b3.shape, const),
        ],
        out_specs=pl.BlockSpec((tb, out_dim), lambda i: (i, 0)),
        compiler_params=pltpu.CompilerParams(
            dimension_semantics=("parallel",),
            vmem_limit_bytes=vmem_limit),
        cost_estimate=pl.CostEstimate(
            flops=flops, transcendentals=0, bytes_accessed=bytes_accessed),
    )(x, w1, b1, w2, b2, w3, b3)

    out = out[:B]   # drop batch padding only; no lane slice needed anymore
    # x.view(-1, num_actions, num_quant) — pure metadata, kept outside kernel.
    return out.reshape(-1, num_actions, num_quant)


def init_critic_params(key, input_dim, action_dim, num_quant):
    """PyTorch nn.Linear-style init: U(-1/sqrt(fan_in), +1/sqrt(fan_in)).

    Weights stored transposed vs. PyTorch, i.e. (in_features, out_features).
    Hidden width zero-padded 64 -> 128 (exact through ReLU and the final
    affine) and cast to bf16; the final output width is left at
    action_dim*num_quant (no lane padding) so the kernel writes only useful
    bytes. Biases stay f32.
    """
    out_dim = action_dim * num_quant
    dims = [(input_dim, HIDDEN), (HIDDEN, HIDDEN), (HIDDEN, out_dim)]
    pad_in = [input_dim, LANE, LANE]
    pad_out = [LANE, LANE, out_dim]
    params = []
    for (fan_in, fan_out), pi, po in zip(dims, pad_in, pad_out):
        key, kw, kb = jax.random.split(key, 3)
        bound = 1.0 / math.sqrt(fan_in)
        w = jax.random.uniform(kw, (fan_in, fan_out), jnp.float32, -bound, bound)
        b = jax.random.uniform(kb, (1, fan_out), jnp.float32, -bound, bound)
        w = jnp.pad(w, ((0, pi - fan_in), (0, po - fan_out))).astype(jnp.bfloat16)
        b = jnp.pad(b, ((0, 0), (0, po - fan_out)))  # f32
        params.extend([w, b])
    return params


if __name__ == "__main__":
    # Small, module-consistent shapes.
    agent_num = 3
    state_dim = 4
    action_dim = 5
    num_quant = 8
    batch = 2
    input_dim = 1 + state_dim * agent_num + agent_num * action_dim  # 28
    out_dim = action_dim * num_quant                                # 40

    key = jax.random.PRNGKey(0)
    kx, kp = jax.random.split(key)
    x = jax.random.normal(kx, (batch, input_dim), jnp.float32)
    params = init_critic_params(kp, input_dim, action_dim, num_quant)

    out = critic_forward(x, params, action_dim, num_quant)
    out = jax.block_until_ready(out)
    assert out.shape == (batch, action_dim, num_quant), out.shape

    # Pure-JAX reference with identical bf16-matmul / f32-accumulate math.
    w1, b1, w2, b2, w3, b3 = params
    xr = x.astype(jnp.bfloat16)
    h = jnp.maximum(jnp.dot(xr, w1, preferred_element_type=jnp.float32) + b1, 0.0)
    h = jnp.maximum(
        jnp.dot(h.astype(jnp.bfloat16), w2, preferred_element_type=jnp.float32) + b2,
        0.0)
    ref = jnp.dot(h.astype(jnp.bfloat16), w3, preferred_element_type=jnp.float32) + b3
    ref = ref.reshape(-1, action_dim, num_quant)
    assert jnp.allclose(out, ref, atol=1e-5, rtol=1e-5), \
        float(jnp.max(jnp.abs(out - ref)))

    # Looser sanity check against f32 math on the (bf16-quantized) weights.
    ref32 = jnp.maximum(x @ w1.astype(jnp.float32) + b1, 0.0)
    ref32 = jnp.maximum(ref32 @ w2.astype(jnp.float32) + b2, 0.0)
    ref32 = (ref32 @ w3.astype(jnp.float32) + b3).reshape(-1, action_dim, num_quant)
    assert jnp.allclose(out, ref32, atol=5e-2, rtol=5e-2)

    print("KERNEL_OK")
</pallas_src>

<mosaic_0001>
module attributes {stable_mosaic.version = 11 : i64} {
  func.func @_critic_kernel(%arg0: i32, %arg1: memref<16x28xf32, #tpu.memory_space<vmem>>, %arg2: memref<28x128xbf16, #tpu.memory_space<vmem>>, %arg3: memref<1x128xf32, #tpu.memory_space<vmem>>, %arg4: memref<128x128xbf16, #tpu.memory_space<vmem>>, %arg5: memref<1x128xf32, #tpu.memory_space<vmem>>, %arg6: memref<128x40xbf16, #tpu.memory_space<vmem>>, %arg7: memref<1x40xf32, #tpu.memory_space<vmem>>, %arg8: memref<16x40xf32, #tpu.memory_space<vmem>>) attributes {dimension_semantics = [#tpu.dimension_semantics<parallel>], iteration_bounds = array<i64: 1>, scalar_prefetch = 0 : i64, scratch_operands = 0 : i64, tpu.core_type = #tpu.core_type<tc>, window_params = [{transform_indices = @transform_0, window_bounds = array<i64: 16, 28>}, {pipeline_mode = #tpu.pipeline_mode<synchronous>, transform_indices = @transform_1, window_bounds = array<i64: 28, 128>}, {pipeline_mode = #tpu.pipeline_mode<synchronous>, transform_indices = @transform_2, window_bounds = array<i64: 1, 128>}, {pipeline_mode = #tpu.pipeline_mode<synchronous>, transform_indices = @transform_3, window_bounds = array<i64: 128, 128>}, {pipeline_mode = #tpu.pipeline_mode<synchronous>, transform_indices = @transform_4, window_bounds = array<i64: 1, 128>}, {pipeline_mode = #tpu.pipeline_mode<synchronous>, transform_indices = @transform_5, window_bounds = array<i64: 128, 40>}, {pipeline_mode = #tpu.pipeline_mode<synchronous>, transform_indices = @transform_6, window_bounds = array<i64: 1, 40>}, {transform_indices = @transform_7, window_bounds = array<i64: 16, 40>}]} {
    %c0 = arith.constant 0 : index
    %c0_0 = arith.constant 0 : index
    %0 = vector.load %arg1[%c0, %c0_0] : memref<16x28xf32, #tpu.memory_space<vmem>>, vector<16x28xf32>
    %1 = arith.truncf %0 : vector<16x28xf32> to vector<16x28xbf16>
    %c0_1 = arith.constant 0 : index
    %c0_2 = arith.constant 0 : index
    %2 = vector.load %arg2[%c0_1, %c0_2] : memref<28x128xbf16, #tpu.memory_space<vmem>>, vector<28x128xbf16>
    %cst = arith.constant dense<0.000000e+00> : vector<16x128xf32>
    %3 = tpu.matmul %1, %2, %cst {dimension_numbers = #tpu.dot_dimension_numbers<[1], [0], [0], [1], [0, 0, 1, 1], [], []>} : vector<16x28xbf16>, vector<28x128xbf16>, vector<16x128xf32> -> vector<16x128xf32>
    %c0_3 = arith.constant 0 : index
    %c0_4 = arith.constant 0 : index
    %4 = vector.load %arg3[%c0_3, %c0_4] : memref<1x128xf32, #tpu.memory_space<vmem>>, vector<1x128xf32>
    %5 = vector.broadcast %4 : vector<1x128xf32> to vector<16x128xf32>
    %6 = arith.addf %3, %5 : vector<16x128xf32>
    %cst_5 = arith.constant 0.000000e+00 : f32
    %7 = vector.broadcast %cst_5 : f32 to vector<16x128xf32>
    %8 = arith.maximumf %6, %7 : vector<16x128xf32>
    %9 = arith.truncf %8 : vector<16x128xf32> to vector<16x128xbf16>
    %c0_6 = arith.constant 0 : index
    %c0_7 = arith.constant 0 : index
    %10 = vector.load %arg4[%c0_6, %c0_7] : memref<128x128xbf16, #tpu.memory_space<vmem>>, vector<128x128xbf16>
    %cst_8 = arith.constant dense<0.000000e+00> : vector<16x128xf32>
    %11 = tpu.matmul %9, %10, %cst_8 {dimension_numbers = #tpu.dot_dimension_numbers<[1], [0], [0], [1], [0, 0, 1, 1], [], []>} : vector<16x128xbf16>, vector<128x128xbf16>, vector<16x128xf32> -> vector<16x128xf32>
    %c0_9 = arith.constant 0 : index
    %c0_10 = arith.constant 0 : index
    %12 = vector.load %arg5[%c0_9, %c0_10] : memref<1x128xf32, #tpu.memory_space<vmem>>, vector<1x128xf32>
    %13 = vector.broadcast %12 : vector<1x128xf32> to vector<16x128xf32>
    %14 = arith.addf %11, %13 : vector<16x128xf32>
    %cst_11 = arith.constant 0.000000e+00 : f32
    %15 = vector.broadcast %cst_11 : f32 to vector<16x128xf32>
    %16 = arith.maximumf %14, %15 : vector<16x128xf32>
    %17 = arith.truncf %16 : vector<16x128xf32> to vector<16x128xbf16>
    %c0_12 = arith.constant 0 : index
    %c0_13 = arith.constant 0 : index
    %18 = vector.load %arg6[%c0_12, %c0_13] : memref<128x40xbf16, #tpu.memory_space<vmem>>, vector<128x40xbf16>
    %cst_14 = arith.constant dense<0.000000e+00> : vector<16x40xf32>
    %19 = tpu.matmul %17, %18, %cst_14 {dimension_numbers = #tpu.dot_dimension_numbers<[1], [0], [0], [1], [0, 0, 1, 1], [], []>} : vector<16x128xbf16>, vector<128x40xbf16>, vector<16x40xf32> -> vector<16x40xf32>
    %c0_15 = arith.constant 0 : index
    %c0_16 = arith.constant 0 : index
    %20 = vector.load %arg7[%c0_15, %c0_16] : memref<1x40xf32, #tpu.memory_space<vmem>>, vector<1x40xf32>
    %21 = vector.broadcast %20 : vector<1x40xf32> to vector<16x40xf32>
    %22 = arith.addf %19, %21 : vector<16x40xf32>
    %c0_17 = arith.constant 0 : index
    %c0_18 = arith.constant 0 : index
    %23 = vector.load %arg8[%c0_17, %c0_18] : memref<16x40xf32, #tpu.memory_space<vmem>>, vector<16x40xf32>
    tpu.vector_store %arg8[%c0_17, %c0_18], %22 {strides = array<i32>} : memref<16x40xf32, #tpu.memory_space<vmem>>, vector<16x40xf32>,
    return
  }
  func.func @transform_0(%arg0: i32) -> (i32, i32) {
    %c0_i32 = arith.constant 0 : i32
    %c0_i32_0 = arith.constant 0 : i32
    return %arg0, %c0_i32 : i32, i32
  }
  func.func @transform_1(%arg0: i32) -> (i32, i32) {
    %c0_i32 = arith.constant 0 : i32
    %c0_i32_0 = arith.constant 0 : i32
    %c0_i32_1 = arith.constant 0 : i32
    return %c0_i32, %c0_i32_0 : i32, i32
  }
  func.func @transform_2(%arg0: i32) -> (i32, i32) {
    %c0_i32 = arith.constant 0 : i32
    %c0_i32_0 = arith.constant 0 : i32
    %c0_i32_1 = arith.constant 0 : i32
    return %c0_i32, %c0_i32_0 : i32, i32
  }
  func.func @transform_3(%arg0: i32) -> (i32, i32) {
    %c0_i32 = arith.constant 0 : i32
    %c0_i32_0 = arith.constant 0 : i32
    %c0_i32_1 = arith.constant 0 : i32
    return %c0_i32, %c0_i32_0 : i32, i32
  }
  func.func @transform_4(%arg0: i32) -> (i32, i32) {
    %c0_i32 = arith.constant 0 : i32
    %c0_i32_0 = arith.constant 0 : i32
    %c0_i32_1 = arith.constant 0 : i32
    return %c0_i32, %c0_i32_0 : i32, i32
  }
  func.func @transform_5(%arg0: i32) -> (i32, i32) {
    %c0_i32 = arith.constant 0 : i32
    %c0_i32_0 = arith.constant 0 : i32
    %c0_i32_1 = arith.constant 0 : i32
    return %c0_i32, %c0_i32_0 : i32, i32
  }
  func.func @transform_6(%arg0: i32) -> (i32, i32) {
    %c0_i32 = arith.constant 0 : i32
    %c0_i32_0 = arith.constant 0 : i32
    %c0_i32_1 = arith.constant 0 : i32
    return %c0_i32, %c0_i32_0 : i32, i32
  }
  func.func @transform_7(%arg0: i32) -> (i32, i32) {
    %c0_i32 = arith.constant 0 : i32
    %c0_i32_0 = arith.constant 0 : i32
    return %arg0, %c0_i32 : i32, i32
  }
}

</mosaic_0001>

<bundles_post_ra>
// kernel: tpu_custom_call.1
= control target key start
LH: loop header
LB: loop body
LE: loop exit
PB: predicated region body
PF: predicated region fallthrough
CT: control target
= control target key end

     0   :  { %12 = vsyncpa [#allocation3], 0  ;;  %s547_s0 = inlined_call_operand.vmem [shape: f32[16,28], index: 0, kind: input, shape index: {}]   ;;  %s548_s1 = inlined_call_operand.hbm [shape: bf16[28,128], index: 1, kind: input, shape index: {}]   ;;  %s549_s2 = inlined_call_operand.vmem [shape: f32[1,128], index: 2, kind: input, shape index: {}]   ;;  %s550_s3 = inlined_call_operand.vmem [shape: bf16[128,128], index: 3, kind: input, shape index: {}]   ;;  %s551_s4 = inlined_call_operand.vmem [shape: f32[1,128], index: 4, kind: input, shape index: {}]   ;;  %s552_s5 = inlined_call_operand.vmem [shape: bf16[128,40], index: 5, kind: input, shape index: {}]   ;;  %s553_s6 = inlined_call_operand.vmem [shape: f32[1,40], index: 6, kind: input, shape index: {}]   ;;  %s554_s7 = inlined_call_operand.hbm [shape: f32[16,40], index: 7, kind: output, shape index: {}]  }
   0x1   :  { %13 = vsyncpa [#allocation4], 0  ;;  %s20_s26 = sshll.u32 %s548_s1, 4  ;;  %s432_s27 = smov [#allocation2]   ;;  %s21_s26 = int_to_ptr.hbm [resolvable:$true] %s20_s26 }
   0x2   :  { %s22_s28 = sshll.u32 %s432_s27, 4  ;;  %s433_s29 = smov 64   ;;  %s23_s28 = int_to_ptr.vmem [resolvable:$true] %s22_s28 }
   0x3   :  { %s434_s30 = smov 4  }
   0x4   :  { %28 = dma.hbm_to_vmem [thread:$0]  %s21_s26, 256, %s23_s28, [#allocation3], %s433_s29, %s433_s29, %s434_s30  }
   0x5   :  { %428 = dma.done.wait [#allocation3], 256  }
   0x6   :  { %429 = vsyncadd [#allocation3], 4294967040  ;;  %v286_v0 = vld [vmem:[#allocation2 + $0x8] sm:$0xf]  ;;  %v354_v1 = vld [vmem:[#allocation2 + $0x8] sm:$0x30] }
   0x7   :  { %vm70_vm0 = vcmask 1045504   ;;  %v287_v2 = vor.u32 %v354_v1, %v286_v0  ;;  %v362_v3 = vld [vmem:[%s550_s3 + $0x38] sm:$0xff]  ;;  %v353_v4 = vld [vmem:[#allocation2] sm:$0xff]  ;;  %v361_v7 = vld [vmem:[%s550_s3 + $0x30] sm:$0xff]  ;;  %vm66_vm1 = vcmask 228352   ;;  %vm258_vm2 = vcmask 326656  }
   0x8   :  { %v44_v6 = vld [vmem:[%s547_s0] sm:$0xff]  ;;  %159 = vmatpush.bf16.msra.mxu1 %v362_v3  ;;  %v45_v8 = vld [vmem:[%s547_s0 + $0x8] sm:$0xff]  ;;  %v358_v12 = vld [vmem:[%s550_s3 + $0x18] sm:$0xff]  ;;  %s436_s24 = smov 128   ;;  %s437_s25 = smov 8  }
   0x9   :  { %v72_v5 = vsel %vm70_vm0, %v287_v2, 0  ;;  %v46_v9 = vpack.c.bf16 %v45_v8, %v44_v6  ;;  %v360_v10 = vld [vmem:[%s550_s3 + $0x28] sm:$0xff]  ;;  %v359_v11 = vld [vmem:[%s550_s3 + $0x20] sm:$0xff]  ;;  %v357_v13 = vld [vmem:[%s550_s3 + $0x10] sm:$0xff] }
   0xa   :  { %80 = vmatpush.bf16.msra.mxu0 %v72_v5  ;;  %v356_v14 = vld [vmem:[%s550_s3 + $0x8] sm:$0xff]  ;;  %v355_v15 = vld [vmem:[%s550_s3] sm:$0xff]  ;;  %v370_v16 = vld [vmem:[%s552_s5 + $0x38] sm:$0xff] }
   0xb   :  { %244 = vmatpush.bf16.msra.mxu2 %v370_v16  ;;  %v369_v17 = vld [vmem:[%s552_s5 + $0x30] sm:$0xff]  ;;  %v368_v18 = vld [vmem:[%s552_s5 + $0x28] sm:$0xff]  ;;  %v367_v19 = vld [vmem:[%s552_s5 + $0x20] sm:$0xff] }
   0xc   :  { %160 = vmatpush.bf16.msra.mxu1 %v361_v7  ;;  %v377_v21 = vld [vmem:[%s549_s2] ss:$0 sm:$0xff]  ;;  %v366_v28 = vld [vmem:[%s552_s5 + $0x18] sm:$0xff]  ;;  %v365_v29 = vld [vmem:[%s552_s5 + $0x10] sm:$0xff] }
   0xd   :  { %v364_v30 = vld [vmem:[%s552_s5 + $0x8] sm:$0xff]  ;;  %v363_v31 = vld [vmem:[%s552_s5] sm:$0xff]  ;;  %s435_s5 = smov [#allocation5]  }
   0xe   :  { %81 = vmatpush.bf16.msra.mxu0 %v353_v4  ;;  %v378_v33 = vld [vmem:[%s551_s4] ss:$0 sm:$0xff]  ;;  %s265_s21 = sshll.u32 %s435_s5, 4  ;;  %s267_s4 = sshll.u32 %s554_s7, 4  ;;  %s266_s21 = int_to_ptr.vmem [resolvable:$true] %s265_s21  ;;  %s268_s4 = int_to_ptr.hbm [resolvable:$true] %s267_s4 }
   0xf   :  { %245 = vmatpush.bf16.msra.mxu2 %v369_v17  ;;  %v379_v40 = vld [vmem:[%s553_s6] ss:$0 sm:$0xff] }
  0x10   :  { %161 = vmatpush.bf16.msra.mxu1 %v360_v10 }
  0x11   :  { %288 = vmatmul.msk.bf16.vlgmr.msra.gmra.mxu0 %vm66_vm1, %v46_v9 }
  0x13   :  { %246 = vmatpush.bf16.msra.mxu2 %v368_v18 }
  0x14   :  { %162 = vmatpush.bf16.msra.mxu1 %v359_v11 }
  0x17   :  { %247 = vmatpush.bf16.msra.mxu2 %v367_v19 }
  0x18   :  { %163 = vmatpush.bf16.msra.mxu1 %v358_v12 }
  0x1b   :  { %248 = vmatpush.bf16.msra.mxu2 %v366_v28 }
  0x1c   :  { %164 = vmatpush.bf16.msra.mxu1 %v357_v13 }
  0x1f   :  { %249 = vmatpush.bf16.msra.mxu2 %v365_v29 }
  0x20   :  { %165 = vmatpush.bf16.msra.mxu1 %v356_v14 }
  0x23   :  { %250 = vmatpush.bf16.msra.mxu2 %v364_v30 }
  0x24   :  { %166 = vmatpush.bf16.msra.mxu1 %v355_v15 }
  0x27   :  { %251 = vmatpush.bf16.msra.mxu2 %v363_v31 }
  0x8e   :  { %v83_v20 = vpop.f32.mrf.mxu0 }
  0x8f   :  { %v84_v22 = vadd.f32 %v377_v21, %v83_v20 }
  0x91   :  { %v88_v25 = vmax.f32 %v84_v22, 0.0 }
  0x96   :  { %v85_v23 = vpop.f32.mrf.mxu0 }
  0x97   :  { %v86_v24 = vadd.f32 %v377_v21, %v85_v23 }
  0x99   :  { %v89_v26 = vmax.f32 %v86_v24, 0.0 }
  0x9b   :  { %v90_v27 = vpack.c.bf16 %v89_v26, %v88_v25 }
  0x9d   :  { %167 = vmatmul.bf16.vlgmr.msra.gmra.mxu1 %v90_v27 }
 0x11a   :  { %v168_v32 = vpop.f32.mrf.mxu1 }
 0x11b   :  { %v169_v34 = vadd.f32 %v378_v33, %v168_v32 }
 0x11d   :  { %v173_v37 = vmax.f32 %v169_v34, 0.0 }
 0x122   :  { %v170_v35 = vpop.f32.mrf.mxu1 }
 0x123   :  { %v171_v36 = vadd.f32 %v378_v33, %v170_v35 }
 0x125   :  { %v174_v38 = vmax.f32 %v171_v36, 0.0 }
 0x127   :  { %v175_v39 = vpack.c.bf16 %v174_v38, %v173_v37 }
 0x129   :  { %252 = vmatmul.bf16.vlgmr.msra.gmra.mxu2 %v175_v39 }
 0x1ac   :  { %v253_v41 = vpop.f32.mrf.mxu2 }
 0x1ad   :  { %v254_v42 = vadd.f32 %v379_v40, %v253_v41 }
 0x1af   :  { %259 = vst.msk [vmem:[#allocation5] sm:$0xff] %vm258_vm2, %v254_v42 }
 0x1b4   :  { %v255_v43 = vpop.f32.mrf.mxu2 }
 0x1b5   :  { %v256_v44 = vadd.f32 %v379_v40, %v255_v43 }
 0x1b7   :  { %260 = vst.msk [vmem:[#allocation5 + $0x8] sm:$0xff] %vm258_vm2, %v256_v44 }
 0x1b8   :  { %273 = dma.vmem_to_hbm [thread:$0]  %s266_s21, 256, %s268_s4, [#allocation4], %s436_s24, %s436_s24, %s437_s25  }
 0x1b9   :  { %430 = dma.done.wait [#allocation4], 256  }
 0x1ba   :  { %431 = vsyncadd [#allocation4], 4294967040 }
 0x1bb   :  { %278 = vsyncpa [#allocation3], 1 }
 0x1bc   :  { %279 = vsyncpa [#allocation4], 1 }

</bundles_post_ra>
